<compile_context>
chip_gen: v7x
topology: tpu7x:2x2x1
jax: 0.10.0
libtpu: 0.0.40
codegen_flags: <defaults>
</compile_context>

<pallas_src>
import functools

import numpy as np
import jax
import jax.numpy as jnp
from jax import lax
from jax.experimental import pallas as pl
from jax.experimental.pallas import tpu as pltpu

_NEG = -1e30  # finite "-inf": never wins a max, and 0 * _NEG stays finite in the selection matmul


# ------------------------- Pallas kernel ------------------------- #

def _stem_kernel(x_ref, w_ref, s_ref, o_ref, *, Wq, Wo, Ho, Hm, Wm, E):
    """One batch element per grid step.

    x_ref: (1, Mpad, 16*C)  phase-packed, column-offset-folded input rows
    w_ref: (64*C, E)        im2col weight (kh/kw == 7 taps zeroed)
    s_ref: (Wm*Hm, Ho*Wq)   0/1 selection matrix for the stride-2 pool subsample
    o_ref: (1, Hm, Wm*E)    lane-dense pooled output
    """
    Mrow = Ho * Wq
    x = x_ref[0]  # (Mpad, 16*C)

    # ---- conv1: single im2col matmul (fold the 4 row-phase offsets onto K) ----
    patch = jnp.concatenate(
        [x[a * Wq: a * Wq + Mrow, :] for a in range(4)], axis=1
    )  # (Mrow, 64*C)
    conv = jnp.dot(patch, w_ref[...], preferred_element_type=jnp.float32)  # (Mrow, E)
    # conv rows are flattened (i, j) with stride Wq; columns j >= Wo are unused filler.

    # ---- maxpool 3x3 / s2 / p1 (dense ops only, no scratch) ----
    col = lax.broadcasted_iota(jnp.int32, (Mrow, 1), 0) % Wq
    convm = jnp.where(col < Wo, conv, _NEG)                      # mask filler columns

    neg_row = jnp.full((1, E), _NEG, jnp.float32)
    left = jnp.concatenate([neg_row, convm[:-1, :]], axis=0)     # col j-1
    right = jnp.concatenate([convm[1:, :], neg_row], axis=0)     # col j+1
    m1 = jnp.maximum(jnp.maximum(convm, left), right)            # W-direction 3-max

    neg_blk = jnp.full((Wq, E), _NEG, jnp.float32)
    up = jnp.concatenate([neg_blk, m1[:-Wq, :]], axis=0)         # row i-1
    down = jnp.concatenate([m1[Wq:, :], neg_blk], axis=0)        # row i+1
    m2 = jnp.maximum(jnp.maximum(m1, up), down)                  # full stride-1 3x3 max

    # stride-2 subsample at (2p, 2q) via a 0/1 selection matmul (rows are q-major)
    pooled = jnp.dot(s_ref[...], m2, preferred_element_type=jnp.float32)  # (Wm*Hm, E)

    # lane-dense output: (Hm, Wm*E)
    out2d = jnp.concatenate(
        [pooled[q * Hm: (q + 1) * Hm, :] for q in range(Wm)], axis=1
    )
    o_ref[0] = out2d.astype(o_ref.dtype)


# ------------------------- wrapper ------------------------- #

def resnet_input_proj(x_nchw: jax.Array, w_oihw: jax.Array) -> jax.Array:
    """Forward of ResnetInputProj.  x: (N, C, H, W) f32; w: (E, C, 7, 7) f32."""
    N, C, H, W = x_nchw.shape
    E = w_oihw.shape[0]

    Ho = (H + 2 * 3 - 7) // 2 + 1           # conv output spatial
    Wo = (W + 2 * 3 - 7) // 2 + 1
    Hm = (Ho + 2 * 1 - 3) // 2 + 1          # maxpool output spatial
    Wm = (Wo + 2 * 1 - 3) // 2 + 1

    # pad the conv-padded extent up to even so the 2x2 space-to-depth is exact
    Hp = H + 6 + ((H + 6) % 2)
    Wp = W + 6 + ((W + 6) % 2)
    Hq, Wq = Hp // 2, Wp // 2               # always Hq == Ho + 3, Wq == Wo + 3

    # --- input glue: NHWC, zero-pad, 2x2 space-to-depth, flatten, fold kw offsets ---
    x = jnp.transpose(x_nchw, (0, 2, 3, 1))                                    # NHWC
    x = jnp.pad(x, ((0, 0), (3, Hp - H - 3), (3, Wp - W - 3), (0, 0)))          # (N,Hp,Wp,C)
    x = x.reshape(N, Hq, 2, Wq, 2, C).transpose(0, 1, 3, 2, 4, 5)               # (N,Hq,Wq,2,2,C)
    x = x.reshape(N, Hq * Wq, 4 * C)                                            # phase-packed rows
    x = jnp.pad(x, ((0, 0), (0, 3), (0, 0)))
    x_cols = jnp.concatenate(
        [x[:, b: b + Hq * Wq, :] for b in range(4)], axis=-1
    )                                                                           # (N, Hq*Wq, 16C)
    Mpad = ((Hq * Wq + 7) // 8) * 8
    x_cols = jnp.pad(x_cols, ((0, 0), (0, Mpad - Hq * Wq), (0, 0)))             # (N, Mpad, 16C)

    # --- weight: (E,C,7,7) -> im2col (64*C, E), matching the patch channel ordering ---
    w = jnp.transpose(w_oihw, (2, 3, 1, 0))                     # (7,7,C,E)
    w = jnp.pad(w, ((0, 1), (0, 1), (0, 0), (0, 0)))             # (8,8,C,E): kh/kw==7 taps are 0
    w = w.reshape(4, 2, 4, 2, C, E).transpose(0, 2, 1, 3, 4, 5)  # (a, b, rp, cp, c, e)
    w = w.reshape(64 * C, E)

    # --- constant 0/1 selection matrix for the stride-2 pool subsample (q-major rows) ---
    Mrow = Ho * Wq
    sel_np = np.zeros((Wm * Hm, Mrow), np.float32)
    for q in range(Wm):
        for p in range(Hm):
            sel_np[q * Hm + p, (2 * p) * Wq + 2 * q] = 1.0
    sel = jnp.asarray(sel_np)

    kernel = functools.partial(_stem_kernel, Wq=Wq, Wo=Wo, Ho=Ho, Hm=Hm, Wm=Wm, E=E)

    out = pl.pallas_call(
        kernel,
        out_shape=jax.ShapeDtypeStruct((N, Hm, Wm * E), x_nchw.dtype),
        grid_spec=pltpu.PrefetchScalarGridSpec(
            num_scalar_prefetch=0,
            grid=(N,),
            in_specs=[
                pl.BlockSpec((1, Mpad, 16 * C), lambda n: (n, 0, 0)),
                pl.BlockSpec((64 * C, E), lambda n: (0, 0)),       # resident
                pl.BlockSpec((Wm * Hm, Mrow), lambda n: (0, 0)),   # resident
            ],
            out_specs=pl.BlockSpec((1, Hm, Wm * E), lambda n: (n, 0, 0)),
        ),
        compiler_params=pltpu.CompilerParams(
            dimension_semantics=("parallel",),
        ),
    )(x_cols, w, sel)

    out = out.reshape(N, Hm, Wm, E)
    return jnp.transpose(out, (0, 3, 1, 2))                       # back to NCHW


# ------------------------- init + reference + main ------------------------- #

def xavier_uniform_conv_weight(key, out_ch, in_ch, kh, kw, dtype=jnp.float32):
    """Matches torch.nn.init.xavier_uniform_ for a conv weight (E, C, kh, kw)."""
    fan_in = in_ch * kh * kw
    fan_out = out_ch * kh * kw
    bound = (6.0 / (fan_in + fan_out)) ** 0.5
    return jax.random.uniform(
        key, (out_ch, in_ch, kh, kw), dtype=dtype, minval=-bound, maxval=bound
    )


def reference(x_nchw, w_oihw):
    conv = lax.conv_general_dilated(
        x_nchw, w_oihw,
        window_strides=(2, 2),
        padding=((3, 3), (3, 3)),
        dimension_numbers=("NCHW", "OIHW", "NCHW"),
    )
    pooled = lax.reduce_window(
        conv, -jnp.inf, lax.max,
        window_dimensions=(1, 1, 3, 3),
        window_strides=(1, 1, 2, 2),
        padding=((0, 0), (0, 0), (1, 1), (1, 1)),
    )
    return pooled


if __name__ == "__main__":
    key = jax.random.PRNGKey(0)
    k_x, k_w = jax.random.split(key)

    N, C, H, W = 2, 4, 16, 16          # image_channels = 4
    E = 32                             # embed_dim = 32

    x = jax.random.normal(k_x, (N, C, H, W), dtype=jnp.float32)
    w = xavier_uniform_conv_weight(k_w, E, C, 7, 7)
    # keep the test data bf16-exact so default-precision MXU passes do not blur the
    # f32 comparison between the kernel and the XLA reference
    x = x.astype(jnp.bfloat16).astype(jnp.float32)
    w = w.astype(jnp.bfloat16).astype(jnp.float32)

    out = jax.block_until_ready(resnet_input_proj(x, w))
    ref = jax.block_until_ready(reference(x, w))

    assert out.shape == ref.shape == (N, E, 4, 4), (out.shape, ref.shape)
    err = float(jnp.abs(out - ref).max())
    assert jnp.allclose(out, ref, atol=2e-2, rtol=2e-2), err

    print("KERNEL_OK")
</pallas_src>

<mosaic_0001>
module attributes {stable_mosaic.version = 11 : i64} {
  func.func @_stem_kernel(%arg0: i32, %arg1: memref<1x128x64xf32, #tpu.memory_space<vmem>>, %arg2: memref<256x32xf32, #tpu.memory_space<vmem>>, %arg3: memref<16x88xf32, #tpu.memory_space<vmem>>, %arg4: memref<1x4x128xf32, #tpu.memory_space<vmem>>) attributes {dimension_semantics = [#tpu.dimension_semantics<parallel>], iteration_bounds = array<i64: 2>, scalar_prefetch = 0 : i64, scratch_operands = 0 : i64, tpu.core_type = #tpu.core_type<tc>, window_params = [{transform_indices = @transform_0, window_bounds = array<i64: 1, 128, 64>}, {pipeline_mode = #tpu.pipeline_mode<synchronous>, transform_indices = @transform_1, window_bounds = array<i64: 256, 32>}, {pipeline_mode = #tpu.pipeline_mode<synchronous>, transform_indices = @transform_2, window_bounds = array<i64: 16, 88>}, {transform_indices = @transform_3, window_bounds = array<i64: 1, 4, 128>}]} {
    %c0 = arith.constant 0 : index
    %c0_0 = arith.constant 0 : index
    %c0_1 = arith.constant 0 : index
    %0 = vector.load %arg1[%c0, %c0_0, %c0_1] : memref<1x128x64xf32, #tpu.memory_space<vmem>>, vector<1x128x64xf32>
    %1 = vector.shape_cast %0 : vector<1x128x64xf32> to vector<128x64xf32>
    %2 = vector.extract_strided_slice %1 {offsets = [0, 0], sizes = [88, 64], strides = [1, 1]} : vector<128x64xf32> to vector<88x64xf32>
    %3 = vector.extract_strided_slice %1 {offsets = [11, 0], sizes = [88, 64], strides = [1, 1]} : vector<128x64xf32> to vector<88x64xf32>
    %4 = vector.extract_strided_slice %1 {offsets = [22, 0], sizes = [88, 64], strides = [1, 1]} : vector<128x64xf32> to vector<88x64xf32>
    %5 = vector.extract_strided_slice %1 {offsets = [33, 0], sizes = [88, 64], strides = [1, 1]} : vector<128x64xf32> to vector<88x64xf32>
    %6 = tpu.concatenate %2, %3, %4, %5 in 1 : vector<88x64xf32>, vector<88x64xf32>, vector<88x64xf32>, vector<88x64xf32> -> vector<88x256xf32>
    %c0_2 = arith.constant 0 : index
    %c0_3 = arith.constant 0 : index
    %7 = vector.load %arg2[%c0_2, %c0_3] : memref<256x32xf32, #tpu.memory_space<vmem>>, vector<256x32xf32>
    %cst = arith.constant dense<0.000000e+00> : vector<88x32xf32>
    %8 = tpu.matmul %6, %7, %cst {dimension_numbers = #tpu.dot_dimension_numbers<[1], [0], [0], [1], [0, 0, 1, 1], [], []>} : vector<88x256xf32>, vector<256x32xf32>, vector<88x32xf32> -> vector<88x32xf32>
    %9 = tpu.iota {dimensions = array<i32: 0>} : vector<88x1xi32>
    %c11_i32 = arith.constant 11 : i32
    %c0_i32 = arith.constant 0 : i32
    %10 = arith.cmpi eq, %c11_i32, %c0_i32 : i32
    %c1_i32 = arith.constant 1 : i32
    %11 = arith.select %10, %c1_i32, %c11_i32 : i32
    %12 = vector.broadcast %11 : i32 to vector<88x1xi32>
    %13 = arith.remsi %9, %12 : vector<88x1xi32>
    %c0_i32_4 = arith.constant 0 : i32
    %14 = vector.broadcast %c0_i32_4 : i32 to vector<88x1xi32>
    %15 = arith.cmpi ne, %13, %14 : vector<88x1xi32>
    %c0_i32_5 = arith.constant 0 : i32
    %16 = vector.broadcast %c0_i32_5 : i32 to vector<88x1xi32>
    %17 = arith.cmpi slt, %13, %16 : vector<88x1xi32>
    %c0_i32_6 = arith.constant 0 : i32
    %18 = arith.cmpi slt, %11, %c0_i32_6 : i32
    %19 = vector.broadcast %18 : i1 to vector<88x1xi1>
    %20 = vector.broadcast %19 : vector<88x1xi1> to vector<88x1xi1>
    %21 = arith.xori %17, %20 : vector<88x1xi1>
    %22 = arith.andi %21, %15 : vector<88x1xi1>
    %23 = vector.broadcast %11 : i32 to vector<88x1xi32>
    %24 = arith.addi %13, %23 : vector<88x1xi32>
    %25 = arith.select %22, %24, %13 : vector<88x1xi1>, vector<88x1xi32>
    %c8_i32 = arith.constant 8 : i32
    %26 = vector.broadcast %c8_i32 : i32 to vector<88x1xi32>
    %27 = arith.cmpi slt, %25, %26 : vector<88x1xi32>
    %cst_7 = arith.constant -1.000000e+30 : f32
    %28 = vector.shape_cast %27 : vector<88x1xi1> to vector<88x1xi1>
    %29 = vector.broadcast %28 : vector<88x1xi1> to vector<88x32xi1>
    %30 = vector.broadcast %cst_7 : f32 to vector<88x32xf32>
    %31 = arith.select %29, %8, %30 : vector<88x32xi1>, vector<88x32xf32>
    %cst_8 = arith.constant -1.000000e+30 : f32
    %32 = vector.broadcast %cst_8 : f32 to vector<1x32xf32>
    %33 = vector.extract_strided_slice %31 {offsets = [0, 0], sizes = [87, 32], strides = [1, 1]} : vector<88x32xf32> to vector<87x32xf32>
    %34 = tpu.concatenate %32, %33 in 0 : vector<1x32xf32>, vector<87x32xf32> -> vector<88x32xf32>
    %35 = vector.extract_strided_slice %31 {offsets = [1, 0], sizes = [87, 32], strides = [1, 1]} : vector<88x32xf32> to vector<87x32xf32>
    %36 = tpu.concatenate %35, %32 in 0 : vector<87x32xf32>, vector<1x32xf32> -> vector<88x32xf32>
    %37 = arith.maximumf %31, %34 : vector<88x32xf32>
    %38 = arith.maximumf %37, %36 : vector<88x32xf32>
    %cst_9 = arith.constant -1.000000e+30 : f32
    %39 = vector.broadcast %cst_9 : f32 to vector<11x32xf32>
    %40 = vector.extract_strided_slice %38 {offsets = [0, 0], sizes = [77, 32], strides = [1, 1]} : vector<88x32xf32> to vector<77x32xf32>
    %41 = tpu.concatenate %39, %40 in 0 : vector<11x32xf32>, vector<77x32xf32> -> vector<88x32xf32>
    %42 = vector.extract_strided_slice %38 {offsets = [11, 0], sizes = [77, 32], strides = [1, 1]} : vector<88x32xf32> to vector<77x32xf32>
    %43 = tpu.concatenate %42, %39 in 0 : vector<77x32xf32>, vector<11x32xf32> -> vector<88x32xf32>
    %44 = arith.maximumf %38, %41 : vector<88x32xf32>
    %45 = arith.maximumf %44, %43 : vector<88x32xf32>
    %c0_10 = arith.constant 0 : index
    %c0_11 = arith.constant 0 : index
    %46 = vector.load %arg3[%c0_10, %c0_11] : memref<16x88xf32, #tpu.memory_space<vmem>>, vector<16x88xf32>
    %cst_12 = arith.constant dense<0.000000e+00> : vector<16x32xf32>
    %47 = tpu.matmul %46, %45, %cst_12 {dimension_numbers = #tpu.dot_dimension_numbers<[1], [0], [0], [1], [0, 0, 1, 1], [], []>} : vector<16x88xf32>, vector<88x32xf32>, vector<16x32xf32> -> vector<16x32xf32>
    %48 = vector.extract_strided_slice %47 {offsets = [0, 0], sizes = [4, 32], strides = [1, 1]} : vector<16x32xf32> to vector<4x32xf32>
    %49 = vector.extract_strided_slice %47 {offsets = [4, 0], sizes = [4, 32], strides = [1, 1]} : vector<16x32xf32> to vector<4x32xf32>
    %50 = vector.extract_strided_slice %47 {offsets = [8, 0], sizes = [4, 32], strides = [1, 1]} : vector<16x32xf32> to vector<4x32xf32>
    %51 = vector.extract_strided_slice %47 {offsets = [12, 0], sizes = [4, 32], strides = [1, 1]} : vector<16x32xf32> to vector<4x32xf32>
    %52 = tpu.concatenate %48, %49, %50, %51 in 1 : vector<4x32xf32>, vector<4x32xf32>, vector<4x32xf32>, vector<4x32xf32> -> vector<4x128xf32>
    %c0_13 = arith.constant 0 : index
    %c0_14 = arith.constant 0 : index
    %c0_15 = arith.constant 0 : index
    %53 = vector.load %arg4[%c0_13, %c0_14, %c0_15] : memref<1x4x128xf32, #tpu.memory_space<vmem>>, vector<1x4x128xf32>
    %54 = vector.shape_cast %53 : vector<1x4x128xf32> to vector<4x128xf32>
    %55 = vector.shape_cast %52 : vector<4x128xf32> to vector<1x4x128xf32>
    tpu.vector_store %arg4[%c0_13, %c0_14, %c0_15], %55 {strides = array<i32>} : memref<1x4x128xf32, #tpu.memory_space<vmem>>, vector<1x4x128xf32>,
    return
  }
  func.func @transform_0(%arg0: i32) -> (i32, i32, i32) {
    %c0_i32 = arith.constant 0 : i32
    %c0_i32_0 = arith.constant 0 : i32
    %c0_i32_1 = arith.constant 0 : i32
    return %arg0, %c0_i32, %c0_i32_0 : i32, i32, i32
  }
  func.func @transform_1(%arg0: i32) -> (i32, i32) {
    %c0_i32 = arith.constant 0 : i32
    %c0_i32_0 = arith.constant 0 : i32
    %c0_i32_1 = arith.constant 0 : i32
    return %c0_i32, %c0_i32_0 : i32, i32
  }
  func.func @transform_2(%arg0: i32) -> (i32, i32) {
    %c0_i32 = arith.constant 0 : i32
    %c0_i32_0 = arith.constant 0 : i32
    %c0_i32_1 = arith.constant 0 : i32
    return %c0_i32, %c0_i32_0 : i32, i32
  }
  func.func @transform_3(%arg0: i32) -> (i32, i32, i32) {
    %c0_i32 = arith.constant 0 : i32
    %c0_i32_0 = arith.constant 0 : i32
    %c0_i32_1 = arith.constant 0 : i32
    return %arg0, %c0_i32, %c0_i32_0 : i32, i32, i32
  }
}

</mosaic_0001>

<bundles_post_ra>
// kernel: tpu_custom_call.1
= control target key start
LH: loop header
LB: loop body
LE: loop exit
PB: predicated region body
PF: predicated region fallthrough
CT: control target
= control target key end

     0   :  { %8 = vsyncpa [#allocation3], 0  ;;  %s2224_s0 = inlined_call_operand.vmem [shape: f32[2,128,64], index: 0, kind: input, shape index: {}]   ;;  %s2225_s1 = inlined_call_operand.vmem [shape: f32[256,32], index: 1, kind: input, shape index: {}]   ;;  %s2226_s2 = inlined_call_operand.vmem [shape: f32[16,88], index: 2, kind: input, shape index: {}]   ;;  %s2227_s3 = inlined_call_operand.hbm [shape: f32[2,4,128], index: 3, kind: output, shape index: {}]  }
   0x1   :  { %10 = vsyncpa [#allocation3 + $0x1], 0  ;;  %s1502_s12 = smov 0   ;;  %s1504_s13 = smov 0  }
   0x2   :  { %s1506_s14 = smov 0   ;;  %s1508_s15 = smov 0  }
   0x3 LB: > { %s1523_s16 = sadd.s32 4294967295, %s1476_s15   ;;  %s1126_s17 = sadd.s32 4294967294, %s1476_s15   ;;  %s1476_s15 = sphi %s1508_s15, %s2279_s15   ;;  %s1472_s14 = sphi %s1506_s14, %s2278_s14   ;;  %s1468_s13 = sphi %s1504_s13, %s2277_s13   ;;  %s1464_s12 = sphi %s1502_s12, %s2276_s12  }
   0x4   : > { %s1527_s18 = sadd.s32 1, %s1476_s15   ;;  %s91_s19 = sadd.s32 1, %s1472_s14 }
   0x5   : > { %s88_s20 = ssub.s32 %s1476_s15, %s1527_s18  ;;  %p101_p0 = scmp.ne.s32.totalorder %s1472_s14, %s1468_s13 }
   0x6   : > { %p89_p1 = scmp.eq.s32.totalorder %s88_s20, 0  ;;  %p102_p2 = scmp.eq.s32.totalorder %s1523_s16, 1 }
   0x7   : > { %p107_p3 = scmp.ne.s32.totalorder %s1468_s13, %s1464_s12  ;;  %p108_p4 = scmp.eq.s32.totalorder %s1126_s17, 1 }
   0x8   : > { %s1538_s21 = scalar_select %p89_p1, %s1472_s14, %s91_s19  }
   0x9   : > { %p1540_p5 = por %p102_p2, %p101_p0  ;;  %p1544_p6 = por %p108_p4, %p107_p3 }
   0xa   : > { %p1129_p7 = scmp.ge.s32.totalorder %s1476_s15, 1  ;;  %p140_p8 = scmp.lt.s32.totalorder %s1476_s15, 3 }
   0xc   : > { %p141_p9 = pnand %p1129_p7, %p140_p8 }
   0xd   : > { %p164_p10 = scmp.lt.s32.totalorder (!%p141_p9), %s1523_s16, 1  ;;  %v388_v0 = vld [vmem:[%s2225_s1 + $0x80] sm:$0xff] (!%p141_p9)  ;;  %v389_v1 = vld [vmem:[%s2225_s1 + $0x88] sm:$0xff] (!%p141_p9)  ;;  %v390_v5 = vld [vmem:[%s2225_s1 + $0x90] sm:$0xff] (!%p141_p9)  ;;  %vm197_vm0 = vcmask (!%p141_p9), 1044480   ;;  %vm292_vm1 = vcmask (!%p141_p9), 1046528  }
   0xe   : > { %144 = sbr.rel (%p141_p9) target bundleno = 778 (0x30a), region = 32  ;;  %v1243_v2 = vpack.c.bf16 (!%p141_p9), %v389_v1, %v388_v0  ;;  %v372_v3 = vld [vmem:[%s2225_s1] sm:$0xff] (!%p141_p9)  ;;  %v373_v4 = vld [vmem:[%s2225_s1 + $0x8] sm:$0xff] (!%p141_p9)  ;;  %v391_v7 = vld [vmem:[%s2225_s1 + $0x98] sm:$0xff] (!%p141_p9)  ;;  %s1478_s25 = smov (!%p141_p9), 64   ;;  %vm255_vm2 = vcmask (!%p141_p9), 1041408  }
   0xf   : > { %v1245_v6 = vpack.c.bf16 (!%p141_p9), %v373_v4, %v372_v3  ;;  %v374_v8 = vld [vmem:[%s2225_s1 + $0x10] sm:$0xff] (!%p141_p9)  ;;  %v375_v9 = vld [vmem:[%s2225_s1 + $0x18] sm:$0xff] (!%p141_p9)  ;;  %v1247_v10 = vpack.c.bf16 (!%p141_p9), %v391_v7, %v390_v5  ;;  %v392_v11 = vld [vmem:[%s2225_s1 + $0xa0] sm:$0xff] (!%p141_p9)  ;;  %vm2228_vm3 = vcmask (!%p141_p9), 523264   ;;  %vm952_vm4 = vcmask (!%p141_p9), 719872   ;;  %s1480_s30 = smov (!%p141_p9), 96  }
  0x10   : > { %1244 = vmatprep.subr.bf16.mxu0 (!%p141_p9), %v1243_v2  ;;  %v393_v12 = vld [vmem:[%s2225_s1 + $0xa8] sm:$0xff] (!%p141_p9)  ;;  %v376_v13 = vld [vmem:[%s2225_s1 + $0x20] sm:$0xff] (!%p141_p9)  ;;  %v1249_v14 = vpack.c.bf16 (!%p141_p9), %v375_v9, %v374_v8  ;;  %v394_v16 = vld [vmem:[%s2225_s1 + $0xb0] sm:$0xff] (!%p141_p9)  ;;  %s161_s4 = sand.u32 (!%p141_p9), 1, %s1468_s13   ;;  %s1136_s6 = sshll.u32 (!%p141_p9), %s1523_s16, 6 }
  0x11   : > { %1246 = vmatpush3.bf16.msra.mxu0 (!%p141_p9), %v1245_v6  ;;  %v377_v15 = vld [vmem:[%s2225_s1 + $0x28] sm:$0xff] (!%p141_p9)  ;;  %v395_v17 = vld [vmem:[%s2225_s1 + $0xb8] sm:$0xff] (!%p141_p9)  ;;  %v1251_v18 = vpack.c.bf16 (!%p141_p9), %v393_v12, %v392_v11  ;;  %v378_v23 = vld [vmem:[%s2225_s1 + $0x30] sm:$0xff] (!%p141_p9)  ;;  %s1130_s5 = sshll.u32 (!%p141_p9), %s161_s4, 2  ;;  %s2182_s11 = scalar_lea.hbm (!%p141_p9), %s2227_s3, %s1136_s6 }
  0x12   : > { %1248 = vmatprep.subr.bf16.mxu0 (!%p141_p9), %v1247_v10  ;;  %v1253_v22 = vpack.c.bf16 (!%p141_p9), %v377_v15, %v376_v13  ;;  %v379_v24 = vld [vmem:[%s2225_s1 + $0x38] sm:$0xff] (!%p141_p9)  ;;  %v1255_v31 = vpack.c.bf16 (!%p141_p9), %v395_v17, %v394_v16  ;;  %v396_v12 = vld [vmem:[%s2225_s1 + $0xc0] sm:$0xff] (!%p141_p9)  ;;  %v397_v16 = vld [vmem:[%s2225_s1 + $0xc8] sm:$0xff] (!%p141_p9)  ;;  %s163_s8 = scalar_lea.vmem (!%p141_p9), [#allocation2], %s1130_s5  ;;  %s1481_s19 = smov (!%p141_p9), [#allocation2]  }
  0x13   : > { %v1257_v52 = vpack.c.bf16 (!%p141_p9), %v379_v24, %v378_v23  ;;  %v380_v17 = vld [vmem:[%s2225_s1 + $0x40] sm:$0xff] (!%p141_p9)  ;;  %s1067_s9 = sshll.u32 (!%p141_p9), %s163_s8, 4  ;;  %s1418_s20 = sshll.u32 (!%p141_p9), %s1481_s19, 4  ;;  %s2184_s9 = int_to_ptr.vmem [resolvable:$true] %s1067_s9  ;;  %s1419_s20 = int_to_ptr.vmem [resolvable:$false] %s1418_s20 }
  0x14   : > { %s1420_s24 = scalar_lea.vmem (!%p141_p9), %s1419_s20, 128  ;;  %p1421_p0 = scmp.lt.s32.totalorder (!%p141_p9), %s2184_s9, %s1419_s20 }
  0x15   : > { %s165_s7 = scalar_select %p164_p10, %s1523_s16, 1  ;;  %1250 = vmatpush3.bf16.msra.mxu0 %v1249_v14 }
  0x16   : > { %1252 = vmatprep.subr.bf16.mxu0 %v1251_v18  ;;  %v381_v18 = vld [vmem:[%s2225_s1 + $0x48] sm:$0xff]  ;;  %s1054_s16 = scalar_lea.sflag [#allocation3], %s161_s4 }
  0x17   : > { %s1139_s29 = sshll.u32 %s165_s7, 7  ;;  %s1414_s7 = scalar_lea.vmem %s2184_s9, 64 }
  0x18   : > { %s1597_s17 = scalar_lea.vmem %s2224_s0, %s1139_s29  ;;  %s1479_s29 = smov 32  }
  0x19   : > { %v1600_v19 = vld [vmem:[%s1597_s17 + $0x8] sm:$0xff]  ;;  %v1603_v20 = vld [vmem:[%s1597_s17 + $0x10] sm:$0xff]  ;;  %v1606_v21 = vld [vmem:[%s1597_s17 + $0x20] sm:$0xff]  ;;  %1254 = vmatpush3.bf16.msra.mxu0 %v1253_v22  ;;  %p1415_p11 = scmp.ne.s32.totalorder %s2184_s9, %s1414_s7  ;;  %p1422_p1 = scmp.lt.s32.totalorder %s1420_s24, %s1414_s7 }
  0x1a   : > { %v1615_v25 = vld [vmem:[%s1597_s17 + $0x28] sm:$0xff]  ;;  %v198_v26 = vrot.slane %v1600_v19, 3  ;;  %v199_v27 = vrot.slane %v1603_v20, 3  ;;  %v293_v28 = vrot.slane %v1606_v21, 1  ;;  %v1621_v29 = vld [vmem:[%s1597_s17 + $0x18] sm:$0xff]  ;;  %v1624_v30 = vld [vmem:[%s1597_s17 + $0x30] sm:$0xff]  ;;  %1256 = vmatprep.subr.bf16.mxu0 %v1255_v31 }
  0x1b   : > { %v294_v32 = vrot.slane %v1615_v25, 1  ;;  %v201_v33 = vrot.slane %v1621_v29, 3  ;;  %v296_v34 = vrot.slane %v1624_v30, 1  ;;  %v1630_v35 = vld [vmem:[%s1597_s17 + $0x38] sm:$0xff]  ;;  %v203_v36 = vrot.slane %v1606_v21, 3  ;;  %v1634_v37 = vld [vmem:[%s1597_s17 + $0x40] sm:$0xff]  ;;  %p1416_p12 = pnand %p1415_p11, %p1540_p5  ;;  %p1423_p2 = por %p1422_p1, %p1421_p0 }
  0x1c   : > { %v200_v38 = vsel %vm197_vm0, %v198_v26, %v199_v27  ;;  %v298_v39 = vrot.slane %v1630_v35, 1  ;;  %v205_v40 = vrot.slane %v1615_v25, 3  ;;  %v300_v41 = vrot.slane %v1634_v37, 1  ;;  %v1641_v42 = vld [vmem:[%s1597_s17 + $0x48] sm:$0xff]  ;;  %v1648_v47 = vld [vmem:[%s1597_s17 + $0x50] sm:$0xff]  ;;  %v1653_v51 = vld [vmem:[%s1597_s17 + $0x58] sm:$0xff] }
  0x1d   : > { %v295_v43 = vsel %vm292_vm1, %v293_v28, %v294_v32  ;;  %v202_v44 = vsel %vm197_vm0, %v199_v27, %v201_v33  ;;  %v297_v45 = vsel %vm292_vm1, %v294_v32, %v296_v34  ;;  %v204_v46 = vsel %vm197_vm0, %v201_v33, %v203_v36  ;;  %v1663_v61 = vld [vmem:[%s1597_s17 + $0x60] sm:$0xff]  ;;  %v1673_v5 = vld [vmem:[%s1597_s17 + $0x68] sm:$0xff]  ;;  %v183_v7 = vld [vmem:[%s1597_s17 + $0x70] sm:$0xff]  ;;  %1258 = vmatpush3.bf16.msra.mxu0 %v1257_v52  ;;  %p1417_p13 = pneg %p1416_p12 }
  0x1e   : > { %v1359_v48 = vpack.i.bf16 %v200_v38, %v295_v43  ;;  %v299_v49 = vsel %vm292_vm1, %v296_v34, %v298_v39  ;;  %v206_v50 = vsel %vm197_vm0, %v203_v36, %v205_v40  ;;  %v301_v54 = vsel %vm292_vm1, %v298_v39, %v300_v41  ;;  %v184_v11 = vld [vmem:[%s1597_s17 + $0x78] sm:$0xff]  ;;  %v398_v27 = vld [vmem:[%s2225_s1 + $0xd0] sm:$0xff] }
  0x1f   : > { %v1369_v53 = vpack.i.bf16 %v204_v46, %v299_v49  ;;  %v207_v55 = vrot.slane %v1624_v30, 3  ;;  %v302_v56 = vrot.slane %v1641_v42, 1  ;;  %v1364_v57 = vpack.i.bf16 %v202_v44, %v297_v45  ;;  %v399_v28 = vld [vmem:[%s2225_s1 + $0xd8] sm:$0xff]  ;;  %v382_v38 = vld [vmem:[%s2225_s1 + $0x50] sm:$0xff]  ;;  %v400_v45 = vld [vmem:[%s2225_s1 + $0xe0] sm:$0xff]  ;;  %p1424_p3 = pnand %p1423_p2, %p1417_p13 }
  0x20   : > { %1360 = vrot.lane.b32.xlu0 %v1359_v48, %s1478_s25  ;;  %v209_v58 = vrot.slane %v1630_v35, 3  ;;  %v304_v59 = vrot.slane %v1648_v47, 1  ;;  %v211_v60 = vrot.slane %v1634_v37, 3  ;;  %v1374_v62 = vpack.i.bf16 %v206_v50, %v301_v54  ;;  %v383_v39 = vld [vmem:[%s2225_s1 + $0x58] sm:$0xff]  ;;  %v401_v46 = vld [vmem:[%s2225_s1 + $0xe8] sm:$0xff]  ;;  %v384_v54 = vld [vmem:[%s2225_s1 + $0x60] sm:$0xff] }
  0x21   : > { %1370 = vrot.lane.b32.xlu1 %v1369_v53, %s1478_s25  ;;  %v208_v63 = vsel %vm197_vm0, %v205_v40, %v207_v55  ;;  %v303_v0 = vsel %vm292_vm1, %v300_v41, %v302_v56  ;;  %v306_v1 = vrot.slane %v1653_v51, 1  ;;  %v213_v4 = vrot.slane %v1641_v42, 3 }
  0x22   : > { %v210_v2 = vsel %vm197_vm0, %v207_v55, %v209_v58  ;;  %v305_v3 = vsel %vm292_vm1, %v302_v56, %v304_v59  ;;  %v308_v6 = vrot.slane %v1663_v61, 1  ;;  %v1379_v8 = vpack.i.bf16 %v208_v63, %v303_v0  ;;  %v385_v55 = vld [vmem:[%s2225_s1 + $0x68] sm:$0xff] }
  0x23   : > { %v212_v9 = vsel %vm197_vm0, %v209_v58, %v211_v60  ;;  %v307_v10 = vsel %vm292_vm1, %v304_v59, %v306_v1  ;;  %v1384_v13 = vpack.i.bf16 %v210_v2, %v305_v3  ;;  %v215_v14 = vrot.slane %v1648_v47, 3  ;;  %v402_v59 = vld [vmem:[%s2225_s1 + $0xf0] sm:$0xff]  ;;  %v387_v2 = vld [vmem:[%s2225_s1 + $0x78] sm:$0xff] }
  0x24   : > { %1365 = vrot.lane.b32.xlu0 %v1364_v57, %s1478_s25  ;;  %v310_v15 = vrot.slane %v1673_v5, 1  ;;  %v214_v22 = vsel %vm197_vm0, %v211_v60, %v213_v4  ;;  %v309_v23 = vsel %vm292_vm1, %v306_v1, %v308_v6  ;;  %v217_v24 = vrot.slane %v1653_v51, 3  ;;  %v403_v60 = vld [vmem:[%s2225_s1 + $0xf8] sm:$0xff]  ;;  %v386_v1 = vld [vmem:[%s2225_s1 + $0x70] sm:$0xff] }
  0x25   : > { %1375 = vrot.lane.b32.xlu1 %v1374_v62, %s1478_s25  ;;  %v312_v26 = vrot.slane %v183_v7, 1  ;;  %v1389_v31 = vpack.i.bf16 %v212_v9, %v307_v10  ;;  %v219_v32 = vrot.slane %v1663_v61, 3  ;;  %v314_v33 = vrot.slane %v184_v11, 1 }
  0x26   : > { %v1259_v34 = vpack.c.bf16 %v397_v16, %v396_v12  ;;  %v1261_v36 = vpack.c.bf16 %v381_v18, %v380_v17  ;;  %v1394_v40 = vpack.i.bf16 %v214_v22, %v309_v23  ;;  %v216_v41 = vsel %vm197_vm0, %v213_v4, %v215_v14 }
  0x27   : > { %v311_v43 = vsel %vm292_vm1, %v308_v6, %v310_v15  ;;  %v1263_v44 = vpack.c.bf16 %v399_v28, %v398_v27  ;;  %v218_v48 = vsel %vm197_vm0, %v215_v14, %v217_v24  ;;  %v313_v49 = vsel %vm292_vm1, %v310_v15, %v312_v26 }
  0x28   : > { %1380 = vrot.lane.b32.xlu0 %v1379_v8, %s1478_s25  ;;  %1260 = vmatprep.subr.bf16.mxu0 %v1259_v34  ;;  %v1265_v50 = vpack.c.bf16 %v383_v39, %v382_v38  ;;  %v1399_v52 = vpack.i.bf16 %v216_v41, %v311_v43  ;;  %v1267_v53 = vpack.c.bf16 %v401_v46, %v400_v45  ;;  %v273_v4 = vrot.slane %v1653_v51, 6 }
  0x29   : > { %1385 = vrot.lane.b32.xlu1 %v1384_v13, %s1478_s25  ;;  %1262 = vmatpush3.bf16.msra.mxu0 %v1261_v36  ;;  %v1404_v56 = vpack.i.bf16 %v218_v48, %v313_v49  ;;  %v220_v57 = vsel %vm197_vm0, %v217_v24, %v219_v32  ;;  %v315_v58 = vsel %vm292_vm1, %v312_v26, %v314_v33  ;;  %v275_v6 = vrot.slane %v1663_v61, 6  ;;  %v169_v61 = vld [vmem:[%s1597_s17] sm:$0xff] }
  0x2a   : > { %1264 = vmatprep.subr.bf16.mxu0 %v1263_v44  ;;  %v1269_v62 = vpack.c.bf16 %v385_v55, %v384_v54  ;;  %v1409_v63 = vpack.i.bf16 %v220_v57, %v315_v58  ;;  %v1271_v0 = vpack.c.bf16 %v403_v60, %v402_v59  ;;  %v1273_v3 = vpack.c.bf16 %v387_v2, %v386_v1 }
  0x2b   : > { %v1754_v7 = vsel %vm255_vm2, %v273_v4, %v275_v6  ;;  %v277_v8 = vrot.slane %v1673_v5, 6  ;;  %v256_v10 = vrot.slane %v1603_v20, 6  ;;  %v257_v11 = vrot.slane %v1621_v29, 6 }
  0x2c   : > { %1390 = vrot.lane.b32.xlu0 %v1389_v31, %s1478_s25  ;;  %v259_v14 = vrot.slane %v1606_v21, 6  ;;  %v261_v15 = vrot.slane %v1615_v25, 6  ;;  %v263_v28 = vrot.slane %v1624_v30, 6  ;;  %v265_v44 = vrot.slane %v1630_v35, 6 }
  0x2d   : > { %1395 = vrot.lane.b32.xlu1 %v1394_v40, %s1478_s25  ;;  %1266 = vmatpush3.bf16.msra.mxu0 %v1265_v50  ;;  %v1758_v9 = vsel %vm255_vm2, %v275_v6, %v277_v8  ;;  %v258_v13 = vsel %vm255_vm2, %v256_v10, %v257_v11  ;;  %v269_v58 = vrot.slane %v1641_v42, 6  ;;  %v271_v1 = vrot.slane %v1648_v47, 6 }
  0x2e   : > { %1268 = vmatprep.subr.bf16.mxu0 %v1267_v53  ;;  %v260_v26 = vsel %vm255_vm2, %v257_v11, %v259_v14  ;;  %v262_v27 = vsel %vm255_vm2, %v259_v14, %v261_v15  ;;  %v264_v43 = vsel %vm255_vm2, %v261_v15, %v263_v28 }
  0x30   : > { %1400 = vrot.lane.b32.xlu0 %v1399_v52, %s1478_s25  ;;  %v267_v52 = vrot.slane %v1634_v37, 6 }
  0x31   : > { %1405 = vrot.lane.b32.xlu1 %v1404_v56, %s1478_s25  ;;  %1270 = vmatpush3.bf16.msra.mxu0 %v1269_v62 }
  0x32   : > { %1272 = vmatprep.subr.bf16.mxu0 %v1271_v0 }
  0x34   : > { %1410 = vrot.lane.b32.xlu0 %v1409_v63, %s1478_s25 }
  0x35   : > { %1274 = vmatpush3.bf16.msra.mxu0 %v1273_v3 }
  0x92   : > { %v1361_v12 = vpop.permute.xlu0 %1360 }
  0x93   : > { %v1363_v16 = vunpack.i.h.bf16 %v1361_v12  ;;  %v1362_v17 = vunpack.i.l.bf16 %v1361_v12  ;;  %v1371_v18 = vpop.permute.xlu1 %1370 }
  0x94   : > { %v1372_v23 = vunpack.i.l.bf16 %v1371_v18  ;;  %v1373_v34 = vunpack.i.h.bf16 %v1371_v18 }
  0x95   : > { %v361_v5 = vsel %vm2228_vm3, %v258_v13, %v1362_v17  ;;  %v350_v22 = vsel %vm2228_vm3, %v169_v61, %v1363_v16 }
  0x96   : > { %v1366_v24 = vpop.permute.xlu0 %1365  ;;  %468 = vmatprep.mubr.f32.mxu0 %v361_v5  ;;  %v363_v40 = vsel %vm2228_vm3, %v262_v27, %v1372_v23  ;;  %v352_v46 = vsel %vm2228_vm3, %v1603_v20, %v1373_v34  ;;  %v268_v20 = vsel %vm255_vm2, %v265_v44, %v267_v52 }
  0x97   : > { %v1368_v31 = vunpack.i.h.bf16 %v1366_v24  ;;  %v1367_v32 = vunpack.i.l.bf16 %v1366_v24  ;;  %469 = vmatmul.mubr.f32.vlgmr.msra.gmra.mrb[0].mxu0 %v350_v22  ;;  %v1376_v33 = vpop.permute.xlu1 %1375 }
  0x98   : > { %v1377_v39 = vunpack.i.l.bf16 %v1376_v33  ;;  %v1378_v45 = vunpack.i.h.bf16 %v1376_v33 }
  0x99   : > { %v362_v36 = vsel %vm2228_vm3, %v260_v26, %v1367_v32  ;;  %v351_v38 = vsel %vm2228_vm3, %v1600_v19, %v1368_v31  ;;  %v266_v19 = vsel %vm255_vm2, %v263_v28, %v265_v44 }
  0x9a   : > { %473 = vmatprep.mubr.f32.mxu0 %v362_v36  ;;  %v1381_v41 = vpop.permute.xlu0 %1380  ;;  %v364_v49 = vsel %vm2228_vm3, %v264_v43, %v1377_v39  ;;  %v353_v54 = vsel %vm2228_vm3, %v1621_v29, %v1378_v45  ;;  %v270_v29 = vsel %vm255_vm2, %v267_v52, %v269_v58 }
  0x9b   : > { %474 = vmatmul.mubr.f32.gmra.mrb[2].mxu0 %v351_v38  ;;  %v1382_v48 = vunpack.i.l.bf16 %v1381_v41  ;;  %v1386_v50 = vpop.permute.xlu1 %1385  ;;  %v1383_v53 = vunpack.i.h.bf16 %v1381_v41 }
  0x9c   : > { %478 = vmatprep.mubr.f32.mxu0 %v363_v40  ;;  %v1387_v55 = vunpack.i.l.bf16 %v1386_v50  ;;  %v1388_v59 = vunpack.i.h.bf16 %v1386_v50 }
  0x9d   : > { %v365_v56 = vsel %vm2228_vm3, %v266_v19, %v1382_v48  ;;  %v354_v60 = vsel %vm2228_vm3, %v1606_v21, %v1383_v53  ;;  %v272_v21 = vsel %vm255_vm2, %v269_v58, %v271_v1 }
  0x9e   : > { %v1391_v57 = vpop.permute.xlu0 %1390  ;;  %v366_v63 = vsel %vm2228_vm3, %v268_v20, %v1387_v55  ;;  %v355_v3 = vsel %vm2228_vm3, %v1615_v25, %v1388_v59  ;;  %v274_v25 = vsel %vm255_vm2, %v271_v1, %v273_v4 }
  0x9f   : > { %479 = vmatmul.mubr.f32.gmra.mrb[4].mxu0 %v352_v46  ;;  %v1392_v62 = vunpack.i.l.bf16 %v1391_v57  ;;  %v1396_v0 = vpop.permute.xlu1 %1395  ;;  %v1393_v2 = vunpack.i.h.bf16 %v1391_v57 }
  0xa0   : > { %483 = vmatprep.mubr.f32.mxu0 %v364_v49  ;;  %v1397_v6 = vunpack.i.l.bf16 %v1396_v0  ;;  %v1398_v11 = vunpack.i.h.bf16 %v1396_v0 }
  0xa1   : > { %v367_v8 = vsel %vm2228_vm3, %v270_v29, %v1392_v62  ;;  %v356_v12 = vsel %vm2228_vm3, %v1624_v30, %v1393_v2 }
  0xa2   : > { %v1401_v10 = vpop.permute.xlu0 %1400  ;;  %v368_v61 = vsel %vm2228_vm3, %v272_v21, %v1397_v6  ;;  %v357_v16 = vsel %vm2228_vm3, %v1630_v35, %v1398_v11 }
  0xa3   : > { %484 = vmatmul.mubr.f32.gmra.mrb[6].mxu0 %v353_v54  ;;  %v1402_v13 = vunpack.i.l.bf16 %v1401_v10  ;;  %v1406_v14 = vpop.permute.xlu1 %1405  ;;  %v1403_v15 = vunpack.i.h.bf16 %v1401_v10 }
  0xa4   : > { %488 = vmatprep.mubr.f32.mxu0 %v365_v56  ;;  %v1407_v17 = vunpack.i.l.bf16 %v1406_v14  ;;  %v1408_v30 = vunpack.i.h.bf16 %v1406_v14 }
  0xa5   : > { %v369_v18 = vsel %vm2228_vm3, %v274_v25, %v1402_v13  ;;  %v358_v22 = vsel %vm2228_vm3, %v1634_v37, %v1403_v15  ;;  %v950_v37 = vld [vmem:[%s2226_s2] sm:$0xff] }
  0xa6   : > { %v1411_v5 = vpop.permute.xlu0 %1410  ;;  %v370_v51 = vsel %vm2228_vm3, %v1754_v7, %v1407_v17  ;;  %v359_v35 = vsel %vm2228_vm3, %v1641_v42, %v1408_v30  ;;  %1240 = vmatprep.mubr.msk.f32.mxu1 %vm952_vm4, %v950_v37  ;;  %v524_v7 = vlaneseq }
  0xa7   : > { %489 = vmatmul.mubr.f32.gmra.mrb[8].mxu0 %v354_v60  ;;  %v1412_v23 = vunpack.i.l.bf16 %v1411_v5  ;;  %v1413_v4 = vunpack.i.h.bf16 %v1411_v5 }
  0xa8   : > { %493 = vmatprep.mubr.f32.mxu0 %v366_v63  ;;  %v1819_v27 = vshrl.u32 %v524_v7, 7 }
  0xa9   : > { %v371_v24 = vsel %vm2228_vm3, %v1758_v9, %v1412_v23  ;;  %v360_v26 = vsel %vm2228_vm3, %v1648_v47, %v1413_v4 }
  0xaa   : > { %v526_v42 = vadd.s32 8, %v1819_v27  ;;  %v1823_v9 = vmul.u32.u64.low 3123612579, %v1819_v27  ;;  %v1824_v28 = vmul.u32.u64.high 3123612579, %v1819_v27, %v1823_v9  ;;  %v527_v31 = vadd.s32 16, %v1819_v27 }
  0xab   : > { %494 = vmatmul.mubr.f32.gmra.mrb[10].mxu0 %v355_v3  ;;  %v528_v47 = vadd.s32 24, %v1819_v27  ;;  %v529_v34 = vadd.s32 32, %v1819_v27  ;;  %v530_v41 = vadd.s32 40, %v1819_v27  ;;  %v531_v46 = vadd.s32 48, %v1819_v27 }
  0xac   : > { %498 = vmatprep.mubr.f32.mxu0 %v367_v8  ;;  %v1828_v32 = vmul.u32.u64.low 3123612579, %v526_v42  ;;  %v1829_v33 = vmul.u32.u64.high 3123612579, %v526_v42, %v1828_v32  ;;  %v1832_v36 = vmul.u32.u64.low 3123612579, %v527_v31  ;;  %v1833_v38 = vmul.u32.u64.high 3123612579, %v527_v31, %v1832_v36 }
  0xad   : > { %v1835_v39 = vmul.u32.u64.low 3123612579, %v528_v47  ;;  %v1836_v40 = vmul.u32.u64.high 3123612579, %v528_v47, %v1835_v39  ;;  %v542_v43 = vshrl.u32 %v1824_v28, 3  ;;  %v1854_v57 = vadd.s32 56, %v1819_v27 }
  0xae   : > { %v1840_v44 = vmul.u32.u64.low 3123612579, %v529_v34  ;;  %v1841_v45 = vmul.u32.u64.high 3123612579, %v529_v34, %v1840_v44  ;;  %v1844_v48 = vmul.u32.u64.low 3123612579, %v530_v41  ;;  %v1845_v49 = vmul.u32.u64.high 3123612579, %v530_v41, %v1844_v48 }
  0xaf   : > { %499 = vmatmul.mubr.f32.gmra.mrb[12].mxu0 %v356_v12  ;;  %v553_v50 = vshrl.u32 %v1829_v33, 3  ;;  %v543_v19 = vmul.u32 11, %v542_v43  ;;  %v564_v52 = vshrl.u32 %v1833_v38, 3  ;;  %v575_v55 = vshrl.u32 %v1836_v40, 3 }
  0xb0   : > { %503 = vmatprep.mubr.f32.mxu0 %v368_v61  ;;  %v1849_v53 = vmul.u32.u64.low 3123612579, %v531_v46  ;;  %v1850_v54 = vmul.u32.u64.high 3123612579, %v531_v46, %v1849_v53  ;;  %v586_v58 = vshrl.u32 %v1841_v45, 3  ;;  %v597_v62 = vshrl.u32 %v1845_v49, 3 }
  0xb1   : > { %v554_v56 = vmul.u32 11, %v553_v50  ;;  %v544_v20 = vsub.s32 %v1819_v27, %v543_v19  ;;  %v565_v59 = vmul.u32 11, %v564_v52  ;;  %v1860_v63 = vadd.s32 64, %v1819_v27 }
  0xb2   : > { %v576_v60 = vmul.u32 11, %v575_v55  ;;  %v1863_v29 = vmul.u32.u64.low 3123612579, %v1854_v57  ;;  %v1864_v1 = vmul.u32.u64.high 3123612579, %v1854_v57, %v1863_v29  ;;  %v1867_v3 = vadd.s32 72, %v1819_v27 }
  0xb3   : > { %504 = vmatmul.mubr.f32.gmra.mrb[14].mxu0 %v357_v16  ;;  %v555_v0 = vsub.s32 %v526_v42, %v554_v56  ;;  %vm657_vm5 = vcmp.ne.s32.totalorder %v544_v20, 0  ;;  %vm668_vm6 = vcmp.lt.s32.totalorder %v544_v20, 0  ;;  %v587_v2 = vmul.u32 11, %v586_v58 }
  0xb4   : > { %508 = vmatprep.mubr.f32.mxu0 %v369_v18  ;;  %v690_v6 = vadd.s32 11, %v544_v20  ;;  %v566_v8 = vsub.s32 %v527_v31, %v565_v59  ;;  %v608_v10 = vshrl.u32 %v1850_v54, 3  ;;  %v1870_v21 = vsub.s32 %v528_v47, %v576_v60  ;;  %vm1876_vm7 = vmand %vm668_vm6, %vm657_vm5 }
  0xb5   : > { %v598_v11 = vmul.u32 11, %v597_v62  ;;  %v1873_v12 = vmul.u32.u64.low 3123612579, %v1860_v63  ;;  %v1874_v13 = vmul.u32.u64.high 3123612579, %v1860_v63, %v1873_v12  ;;  %vm658_vm8 = vcmp.ne.s32.totalorder %v555_v0, 0 }
  0xb6   : > { %vm669_vm9 = vcmp.lt.s32.totalorder %v555_v0, 0  ;;  %v1880_v14 = vsub.s32 %v529_v34, %v587_v2  ;;  %v1883_v25 = vmul.u32.u64.low 3123612579, %v1867_v3  ;;  %v1884_v15 = vmul.u32.u64.high 3123612579, %v1867_v3, %v1883_v25 }
  0xb7   : > { %509 = vmatmul.mubr.f32.gmra.mrb[16].mxu0 %v358_v22  ;;  %v691_v16 = vadd.s32 11, %v555_v0  ;;  %vm659_vm10 = vcmp.ne.s32.totalorder %v566_v8, 0  ;;  %vm670_vm11 = vcmp.lt.s32.totalorder %v566_v8, 0  ;;  %v609_v17 = vmul.u32 11, %v608_v10  ;;  %vm1888_vm12 = vmand %vm669_vm9, %vm658_vm8 }
  0xb8   : > { %513 = vmatprep.mubr.f32.mxu0 %v370_v51  ;;  %v701_v18 = vsel %vm1876_vm7, %v690_v6, %v544_v20  ;;  %vm660_vm13 = vcmp.ne.s32.totalorder %v1870_v21, 0  ;;  %vm671_vm14 = vcmp.lt.s32.totalorder %v1870_v21, 0  ;;  %v1894_v30 = vsub.s32 %v530_v41, %v598_v11  ;;  %vm1897_vm15 = vmand %vm670_vm11, %vm659_vm10 }
  0xb9   : > { %v619_v22 = vshrl.u32 %v1864_v1, 3  ;;  %v692_v51 = vadd.s32 11, %v566_v8  ;;  %v693_v4 = vadd.s32 11, %v1870_v21  ;;  %vm661_vm2 = vcmp.ne.s32.totalorder %v1880_v14, 0  ;;  %vm1910_vm7 = vmand %vm671_vm14, %vm660_vm13 }
  0xba   : > { %vm672_vm5 = vcmp.lt.s32.totalorder %v1880_v14, 0  ;;  %vm1904_vm6 = vcmp.lt.s32.totalorder %v701_v18, 8  ;;  %v1914_v7 = vsub.s32 %v531_v46, %v609_v17  ;;  %vm767_vm8 = vcmask 1040384  }
  0xbb   : > { %514 = vmatmul.mubr.f32.gmra.mrb[18].mxu0 %v359_v35  ;;  %v694_v9 = vadd.s32 11, %v1880_v14  ;;  %vm662_vm9 = vcmp.ne.s32.totalorder %v1894_v30, 0  ;;  %v630_v28 = vshrl.u32 %v1874_v13, 3  ;;  %vm1919_vm10 = vmand %vm672_vm5, %vm661_vm2  ;;  %vm673_vm11 = vcmp.lt.s32.totalorder %v1894_v30, 0 }
  0xbc   : > { %518 = vmatprep.mubr.f32.mxu0 %v371_v24  ;;  %v620_v32 = vmul.u32 11, %v619_v22  ;;  %v1925_v33 = vadd.s32 80, %v1819_v27  ;;  %v703_v36 = vsel %vm1897_vm15, %v692_v51, %v566_v8  ;;  %v704_v38 = vsel %vm1910_vm7, %v693_v4, %v1870_v21  ;;  %vm1949_vm15 = vmand %vm673_vm11, %vm662_vm9 }
  0xbd   : > { %v641_v39 = vshrl.u32 %v1884_v15, 3  ;;  %v695_v27 = vadd.s32 11, %v1894_v30  ;;  %vm663_vm13 = vcmp.ne.s32.totalorder %v1914_v7, 0  ;;  %vm674_vm14 = vcmp.lt.s32.totalorder %v1914_v7, 0 }
  0xbe   : > { %v705_v45 = vsel %vm1919_vm10, %v694_v9, %v1880_v14  ;;  %v696_v48 = vadd.s32 11, %v1914_v7  ;;  %v631_v49 = vmul.u32 11, %v630_v28  ;;  %v1955_v19 = vsub.s32 %v1854_v57, %v620_v32  ;;  %vm1966_vm5 = vmand %vm674_vm14, %vm663_vm13 }
  0xbf   : > { %519 = vmatmul.mubr.f32.gmra.mrb[20].mxu0 %v360_v26  ;;  %v702_v26 = vsel %vm1888_vm12, %v691_v16, %v555_v0  ;;  %v1958_v52 = vmul.u32.u64.low 3123612579, %v1925_v33  ;;  %v1959_v53 = vmul.u32.u64.high 3123612579, %v1925_v33, %v1958_v52  ;;  %vm1962_vm2 = vcmp.lt.s32.totalorder %v703_v36, 8 }
  0xc0   : > { %vm1927_vm12 = vcmp.lt.s32.totalorder %v702_v26, 8  ;;  %v642_v20 = vmul.u32 11, %v641_v39  ;;  %v706_v60 = vsel %vm1949_vm15, %v695_v27, %v1894_v30  ;;  %vm866_vm7 = vcmask 1042432  }
  0xc1   : > { %vm1979_vm9 = vcmp.lt.s32.totalorder %v705_v45, 8  ;;  %v1984_v6 = vsub.s32 %v1860_v63, %v631_v49  ;;  %v707_v21 = vsel %vm1966_vm5, %v696_v48, %v1914_v7  ;;  %vm664_vm10 = vcmp.ne.s32.totalorder %v1955_v19, 0 }
  0xc2   : > { %vm675_vm11 = vcmp.lt.s32.totalorder %v1955_v19, 0  ;;  %v1994_v13 = vsub.s32 %v1867_v3, %v642_v20  ;;  %v697_v25 = vadd.s32 11, %v1955_v19  ;;  %v652_v23 = vshrl.u32 %v1959_v53, 3 }
  0xc3   : > { %vm665_vm13 = vcmp.ne.s32.totalorder %v1984_v6, 0  ;;  %vm676_vm14 = vcmp.lt.s32.totalorder %v1984_v6, 0  ;;  %v698_v30 = vadd.s32 11, %v1984_v6  ;;  %vm2016_vm15 = vmand %vm675_vm11, %vm664_vm10  ;;  %vm2031_vm10 = vcmp.lt.s32.totalorder %v707_v21, 8 }
  0xc4   : > { %vm677_vm5 = vcmp.lt.s32.totalorder %v1994_v13, 0  ;;  %vm2024_vm3 = vmand %vm676_vm14, %vm665_vm13  ;;  %v2036_v34 = vadd.s32 11, %v1994_v13  ;;  %v653_v45 = vmul.u32 11, %v652_v23 }
 0x16a   : > { %v1172_v35 = vpop.f32.mrb[0].mxu0 }
 0x16b   : > { %v1173_v42 = vpop.f32.mrb[1].mxu0 }
 0x16c   : > { %v1174_v31 = vadd.f32 %v1173_v42, %v1172_v35 }
 0x16e   : > { %v745_v40 = vsel %vm1904_vm6, %v1174_v31, -1e+30  ;;  %v1175_v41 = vpop.f32.mrb[2].mxu0  ;;  %vm1972_vm6 = vcmp.lt.s32.totalorder %v704_v38, 8  ;;  %v708_v38 = vsel %vm2016_vm15, %v697_v25, %v1955_v19 }
 0x16f   : > { %v768_v43 = vrot.slane %v745_v40, 7  ;;  %v1176_v44 = vpop.f32.mrb[3].mxu0  ;;  %v801_v62 = vrot.slane %v745_v40, 1  ;;  %vm2063_vm11 = vcmp.lt.s32.totalorder %v708_v38, 8 }
 0x170   : > { %v1177_v50 = vadd.f32 %v1176_v44, %v1175_v41  ;;  %v709_v44 = vsel %vm2024_vm3, %v698_v30, %v1984_v6 }
 0x171   : > { %v800_v54 = vsel %vm767_vm8, -1e+30, %v768_v43  ;;  %vm2087_vm3 = vcmp.lt.s32.totalorder %v709_v44, 8 }
 0x172   : > { %v746_v58 = vsel %vm1927_vm12, %v1177_v50, -1e+30  ;;  %v1178_v57 = vpop.f32.mrb[4].mxu0  ;;  %v834_v8 = vmax.f32 %v745_v40, %v800_v54  ;;  %vm2001_vm12 = vcmp.lt.s32.totalorder %v706_v60, 8 }
 0x173   : > { %v769_v0 = vrot.slane %v746_v58, 7  ;;  %v802_v29 = vrot.slane %v746_v58, 1  ;;  %v1179_v1 = vpop.f32.mrb[5].mxu0 }
 0x174   : > { %v1180_v10 = vadd.f32 %v1179_v1, %v1178_v57  ;;  %v2080_v1 = vsub.s32 %v1925_v33, %v653_v45 }
 0x175   : > { %v770_v11 = vsel %vm767_vm8, %v768_v43, %v769_v0  ;;  %v803_v12 = vsel %vm292_vm1, %v801_v62, %v802_v29 }
 0x176   : > { %v835_v61 = vmax.f32 %v746_v58, %v770_v11  ;;  %v747_v63 = vsel %vm1962_vm2, %v1180_v10, -1e+30  ;;  %v1181_v14 = vpop.f32.mrb[6].mxu0  ;;  %v1999_v15 = vmax.f32 %v834_v8, %v803_v12  ;;  %vm666_vm2 = vcmp.ne.s32.totalorder %v1994_v13, 0 }
 0x177   : > { %v771_v16 = vrot.slane %v747_v63, 7  ;;  %v804_v17 = vrot.slane %v747_v63, 1  ;;  %v1182_v18 = vpop.f32.mrb[7].mxu0 }
 0x178   : > { %v1183_v3 = vadd.f32 %v1182_v18, %v1181_v14  ;;  %v867_v22 = vrot.slane %v1999_v15, 5 }
 0x179   : > { %v772_v51 = vsel %vm767_vm8, %v769_v0, %v771_v16  ;;  %v805_v4 = vsel %vm292_vm1, %v802_v29, %v804_v17  ;;  %v928_v29 = vmax.f32 %v1999_v15, -1e+30 }
 0x17a   : > { %v836_v24 = vmax.f32 %v747_v63, %v772_v51  ;;  %v748_v26 = vsel %vm1972_vm6, %v1183_v3, -1e+30  ;;  %v1184_v37 = vpop.f32.mrb[8].mxu0  ;;  %v2028_v42 = vmax.f32 %v835_v61, %v805_v4  ;;  %v896_v9 = vsel %vm866_vm7, -1e+30, %v867_v22  ;;  %vm2046_vm6 = vmand %vm677_vm5, %vm666_vm2 }
 0x17b   : > { %v773_v28 = vrot.slane %v748_v26, 7  ;;  %v806_v31 = vrot.slane %v748_v26, 1  ;;  %v1185_v47 = vpop.f32.mrb[9].mxu0  ;;  %v710_v20 = vsel %vm2046_vm6, %v2036_v34, %v1994_v13 }
 0x17c   : > { %v1186_v36 = vadd.f32 %v1185_v47, %v1184_v37  ;;  %v929_v39 = vmax.f32 %v2028_v42, %v896_v9  ;;  %v868_v41 = vrot.slane %v2028_v42, 5  ;;  %v898_v56 = vrot.slane %v2028_v42, 3 }
 0x17d   : > { %v774_v27 = vsel %vm767_vm8, %v771_v16, %v773_v28  ;;  %v807_v43 = vsel %vm292_vm1, %v804_v17, %v806_v31  ;;  %vm2135_vm14 = vcmp.lt.s32.totalorder %v710_v20, 8 }
 0x17e   : > { %v837_v46 = vmax.f32 %v748_v26, %v774_v27  ;;  %v2056_v48 = vmax.f32 %v836_v24, %v807_v43  ;;  %v749_v49 = vsel %vm1979_vm9, %v1186_v36, -1e+30  ;;  %v1187_v50 = vpop.f32.mrb[10].mxu0  ;;  %v2061_v19 = vsel %vm866_vm7, %v867_v22, %v868_v41 }
 0x17f   : > { %v775_v52 = vrot.slane %v749_v49, 7  ;;  %v808_v53 = vrot.slane %v749_v49, 1  ;;  %v1188_v54 = vpop.f32.mrb[11].mxu0  ;;  %vm667_vm9 = vcmp.ne.s32.totalorder %v2080_v1, 0  ;;  %v700_v36 = vadd.s32 11, %v2080_v1 }
 0x180   : > { %v1189_v58 = vadd.f32 %v1188_v54, %v1187_v50  ;;  %v899_v57 = vrot.slane %v2056_v48, 3  ;;  %v870_v59 = vrot.slane %v2056_v48, 5  ;;  %v930_v60 = vmax.f32 %v2056_v48, %v2061_v19 }
 0x181   : > { %v776_v62 = vsel %vm767_vm8, %v773_v28, %v775_v52  ;;  %v809_v0 = vsel %vm292_vm1, %v806_v31, %v808_v53 }
 0x182   : > { %v838_v2 = vmax.f32 %v749_v49, %v776_v62  ;;  %v2082_v6 = vmax.f32 %v837_v46, %v809_v0  ;;  %v750_v8 = vsel %vm2001_vm12, %v1189_v58, -1e+30  ;;  %v1190_v10 = vpop.f32.mrb[12].mxu0  ;;  %v900_v21 = vsel %vm197_vm0, %v898_v56, %v899_v57 }
 0x183   : > { %v777_v11 = vrot.slane %v750_v8, 7  ;;  %v810_v12 = vrot.slane %v750_v8, 1  ;;  %v1191_v61 = vpop.f32.mrb[13].mxu0  ;;  %v939_v14 = vmax.f32 %v928_v29, %v900_v21  ;;  %v871_v33 = vsel %vm866_vm7, %v868_v41, %v870_v59 }
 0x184   : > { %v1192_v25 = vadd.f32 %v1191_v61, %v1190_v10  ;;  %v901_v15 = vrot.slane %v2082_v6, 3  ;;  %v931_v16 = vmax.f32 %v2082_v6, %v871_v33  ;;  %v872_v17 = vrot.slane %v2082_v6, 5 }
 0x185   : > { %v778_v18 = vsel %vm767_vm8, %v775_v52, %v777_v11  ;;  %v811_v5 = vsel %vm292_vm1, %v808_v53, %v810_v12  ;;  %vm678_vm12 = vcmp.lt.s32.totalorder %v2080_v1, 0 }
 0x186   : > { %v839_v3 = vmax.f32 %v750_v8, %v778_v18  ;;  %v2099_v30 = vmax.f32 %v838_v2, %v811_v5  ;;  %v751_v22 = vsel %vm2031_vm10, %v1192_v25, -1e+30  ;;  %v1193_v23 = vpop.f32.mrb[14].mxu0  ;;  %v902_v51 = vsel %vm197_vm0, %v899_v57, %v901_v15  ;;  %vm2119_vm13 = vmand %vm678_vm12, %vm667_vm9 }
 0x187   : > { %v779_v4 = vrot.slane %v751_v22, 7  ;;  %v812_v35 = vrot.slane %v751_v22, 1  ;;  %v1194_v24 = vpop.f32.mrb[15].mxu0  ;;  %v940_v26 = vmax.f32 %v929_v39, %v902_v51  ;;  %v873_v37 = vsel %vm866_vm7, %v870_v59, %v872_v17 }
 0x188   : > { %v1195_v7 = vadd.f32 %v1194_v24, %v1193_v23  ;;  %v903_v42 = vrot.slane %v2099_v30, 3  ;;  %v874_v9 = vrot.slane %v2099_v30, 5  ;;  %v932_v28 = vmax.f32 %v2099_v30, %v873_v37 }
 0x189   : > { %v780_v31 = vsel %vm767_vm8, %v777_v11, %v779_v4  ;;  %v813_v47 = vsel %vm292_vm1, %v810_v12, %v812_v35  ;;  %v1275_v32 = vpack.c.bf16 %v940_v26, %v939_v14  ;;  %v711_v57 = vsel %vm2119_vm13, %v700_v36, %v2080_v1 }
 0x18a   : > { %v840_v38 = vmax.f32 %v751_v22, %v780_v31  ;;  %v2111_v41 = vmax.f32 %v839_v3, %v813_v47  ;;  %v752_v39 = vsel %vm2063_vm11, %v1195_v7, -1e+30  ;;  %v1196_v27 = vpop.f32.mrb[16].mxu0  ;;  %v904_v44 = vsel %vm197_vm0, %v901_v15, %v903_v42 }
 0x18b   : > { %v781_v45 = vrot.slane %v752_v39, 7  ;;  %v814_v46 = vrot.slane %v752_v39, 1  ;;  %v1197_v48 = vpop.f32.mrb[17].mxu0  ;;  %1276 = vmatprep.subr.bf16.mxu1 %v1275_v32  ;;  %v941_v49 = vmax.f32 %v930_v60, %v904_v44  ;;  %v875_v50 = vsel %vm866_vm7, %v872_v17, %v874_v9 }
 0x18c   : > { %v1198_v19 = vadd.f32 %v1197_v48, %v1196_v27  ;;  %1278 = vmatpush3.bf16.msra.mxu1 %v1275_v32  ;;  %v905_v52 = vrot.slane %v2111_v41, 3  ;;  %v933_v53 = vmax.f32 %v2111_v41, %v875_v50  ;;  %v876_v54 = vrot.slane %v2111_v41, 5 }
 0x18d   : > { %v782_v55 = vsel %vm767_vm8, %v779_v4, %v781_v45  ;;  %v815_v56 = vsel %vm292_vm1, %v812_v35, %v814_v46  ;;  %vm2148_vm15 = vcmp.lt.s32.totalorder %v711_v57, 8 }
 0x18e   : > { %v841_v59 = vmax.f32 %v752_v39, %v782_v55  ;;  %v851_v60 = vmax.f32 %v840_v38, %v815_v56  ;;  %v753_v62 = vsel %vm2087_vm3, %v1198_v19, -1e+30  ;;  %v1199_v0 = vpop.f32.mrb[18].mxu0  ;;  %v906_v29 = vsel %vm197_vm0, %v903_v42, %v905_v52 }
 0x18f   : > { %v783_v40 = vrot.slane %v753_v62, 7  ;;  %v816_v2 = vrot.slane %v753_v62, 1  ;;  %v1200_v6 = vpop.f32.mrb[19].mxu0  ;;  %v942_v13 = vmax.f32 %v931_v16, %v906_v29  ;;  %v877_v34 = vsel %vm866_vm7, %v874_v9, %v876_v54 }
 0x190   : > { %v1201_v20 = vadd.f32 %v1200_v6, %v1199_v0  ;;  %v907_v8 = vrot.slane %v851_v60, 3  ;;  %v878_v10 = vrot.slane %v851_v60, 5  ;;  %v934_v21 = vmax.f32 %v851_v60, %v877_v34 }
 0x191   : > { %v784_v1 = vsel %vm767_vm8, %v781_v45, %v783_v40  ;;  %v817_v11 = vsel %vm292_vm1, %v814_v46, %v816_v2  ;;  %v1279_v61 = vpack.c.bf16 %v942_v13, %v941_v49 }
 0x192   : > { %v842_v63 = vmax.f32 %v753_v62, %v784_v1  ;;  %v852_v14 = vmax.f32 %v841_v59, %v817_v11  ;;  %v754_v33 = vsel %vm2135_vm14, %v1201_v20, -1e+30  ;;  %v1202_v25 = vpop.f32.mrb[20].mxu0  ;;  %v908_v15 = vsel %vm197_vm0, %v905_v52, %v907_v8 }
 0x193   : > { %v785_v16 = vrot.slane %v754_v33, 7  ;;  %v818_v17 = vrot.slane %v754_v33, 1  ;;  %v1203_v18 = vpop.f32.mrb[21].mxu0  ;;  %1280 = vmatprep.subr.bf16.mxu1 %v1279_v61  ;;  %v943_v5 = vmax.f32 %v932_v28, %v908_v15  ;;  %v879_v3 = vsel %vm866_vm7, %v876_v54, %v878_v10 }
 0x194   : > { %v1204_v30 = vadd.f32 %v1203_v18, %v1202_v25  ;;  %1282 = vmatpush3.bf16.msra.mxu1 %v1279_v61  ;;  %v909_v22 = vrot.slane %v852_v14, 3  ;;  %v935_v23 = vmax.f32 %v852_v14, %v879_v3  ;;  %v880_v51 = vrot.slane %v852_v14, 5 }
 0x195   : > { %v786_v4 = vsel %vm767_vm8, %v783_v40, %v785_v16  ;;  %v819_v35 = vsel %vm292_vm1, %v816_v2, %v818_v17  ;;  %v951_v2 = vld [vmem:[%s2226_s2 + $0x8] sm:$0xff] }
 0x196   : > { %v843_v24 = vmax.f32 %v754_v33, %v786_v4  ;;  %v853_v26 = vmax.f32 %v842_v63, %v819_v35  ;;  %v755_v37 = vsel %vm2148_vm15, %v1204_v30, -1e+30  ;;  %v910_v7 = vsel %vm197_vm0, %v907_v8, %v909_v22 }
 0x197   : > { %v787_v42 = vrot.slane %v755_v37, 7  ;;  %v820_v9 = vrot.slane %v755_v37, 1  ;;  %v944_v28 = vmax.f32 %v933_v53, %v910_v7  ;;  %v881_v31 = vsel %vm866_vm7, %v878_v10, %v880_v51 }
 0x198   : > { %v911_v47 = vrot.slane %v853_v26, 3  ;;  %v882_v32 = vrot.slane %v853_v26, 5  ;;  %v936_v36 = vmax.f32 %v853_v26, %v881_v31 }
 0x199   : > { %v788_v38 = vsel %vm767_vm8, %v785_v16, %v787_v42  ;;  %v821_v41 = vsel %vm292_vm1, %v818_v17, %v820_v9  ;;  %v1283_v39 = vpack.c.bf16 %v944_v28, %v943_v5  ;;  %v833_v46 = vsel %vm292_vm1, %v820_v9, -1e+30 }
 0x19a   : > { %v844_v27 = vmax.f32 %v755_v37, %v788_v38  ;;  %v854_v43 = vmax.f32 %v843_v24, %v821_v41  ;;  %v912_v44 = vsel %vm197_vm0, %v909_v22, %v911_v47  ;;  %v883_v45 = vsel %vm866_vm7, %v880_v51, %v882_v32 }
 0x19b   : > { %1284 = vmatprep.subr.bf16.mxu1 %v1283_v39  ;;  %v945_v48 = vmax.f32 %v934_v21, %v912_v44  ;;  %vm1050_vm1 = vcmask 785408  }
 0x19c   : > { %v855_v49 = vmax.f32 %v844_v27, %v833_v46  ;;  %1286 = vmatpush3.bf16.msra.mxu1 %v1283_v39  ;;  %v913_v50 = vrot.slane %v854_v43, 3  ;;  %v937_v19 = vmax.f32 %v854_v43, %v883_v45  ;;  %v884_v52 = vrot.slane %v854_v43, 5 }
 0x19e   : > { %v915_v53 = vrot.slane %v855_v49, 3  ;;  %v914_v54 = vsel %vm197_vm0, %v911_v47, %v913_v50  ;;  %v885_v55 = vsel %vm866_vm7, %v882_v32, %v884_v52 }
 0x19f   : > { %v946_v56 = vmax.f32 %v935_v23, %v914_v54  ;;  %v938_v58 = vmax.f32 %v855_v49, %v885_v55 }
 0x1a0   : > { %v916_v57 = vsel %vm197_vm0, %v913_v50, %v915_v53  ;;  %v927_v59 = vsel %vm197_vm0, %v915_v53, -1e+30  ;;  %vm1047_vm0 = vcmask 261120  }
 0x1a1   : > { %v1287_v60 = vpack.c.bf16 %v946_v56, %v945_v48  ;;  %v947_v62 = vmax.f32 %v936_v36, %v916_v57  ;;  %v948_v0 = vmax.f32 %v937_v19, %v927_v59  ;;  %v949_v40 = vmax.f32 %v938_v58, -1e+30 }
 0x1a3   : > { %1288 = vmatprep.subr.bf16.mxu1 %v1287_v60  ;;  %v1291_v29 = vpack.c.bf16 %v948_v0, %v947_v62 }
 0x1a4   : > { %1290 = vmatpush3.bf16.msra.mxu1 %v1287_v60 }
 0x1a5   : > { %1292 = vmatprep.subr.bf16.mxu1 %v1291_v29 }
 0x1a8   : > { %1294 = vmatpush3.bf16.msra.mxu1 %v1291_v29 }
 0x1a9   : > { %1238 = vmatprep.subr.mxu1 %v949_v40 }
 0x1ac   : > { %1239 = vmatpush3.msra.mxu1 %v949_v40 }
 0x1ad   : > { %1241 = vmatmul.mubr.msk.f32.vlgmr.msra.gmra.mrb[0].mxu1 %vm952_vm4, %v951_v2  ;;  %vm2275_vm4 = vcmask 523264  }
 0x280   : > { %v1242_v6 = vpop.f32.mrb[0].mxu1 }
 0x281   : > { %1040 = vrot.lane.b32.xlu0 %v1242_v6, %s1478_s25  ;;  %v1025_v13 = vpop.f32.mrb[1].mxu1  ;;  %v1043_v20 = vrot.slane %v1242_v6, 4 }
 0x282   : > { %v1035_v34 = vrot.slane %v1025_v13, 4 }
 0x284   : > { %1036 = vrot.lane.b32.xlu1 %v1035_v34, %s1479_s29 }
 0x288   : > { %1044 = vrot.lane.b32.xlu1 %v1043_v20, %s1480_s30 }
 0x2f3   : > { %v1041_v21 = vpop.permute.xlu0 %1040 }
 0x2f6   : > { %v1037_v8 = vpop.permute.xlu1 %1036 }
 0x2f7   : > { %v1048_v10 = vsel %vm1047_vm0, %v1025_v13, %v1037_v8 }
 0x2f8   : > { %v1049_v1 = vsel %vm2275_vm4, %v1048_v10, %v1041_v21 }
 0x2fa   : > { %v1045_v11 = vpop.permute.xlu1 %1044 }
 0x2fb   : > { %v1051_v12 = vsel %vm1050_vm1, %v1049_v1, %v1045_v11 }
 0x2fc   : > { %1052 = vst [vmem:[%s163_s8] sm:$0xf] %v1051_v12 }
 0x2fd   : > { %1427 = shalt.err (!%p1424_p3)
}
 0x2fe   : > { %s1428_s17 = scalar_lea.hbm %s2182_s11, 64  ;;  %s1432_s28 = scalar_lea.hbm %s2227_s3, 128 }
 0x2ff   : > { %p1429_p4 = scmp.ne.s32.totalorder %s2182_s11, %s1428_s17  ;;  %p1433_p9 = scmp.lt.u32.totalorder %s2182_s11, %s2227_s3 }
 0x300   : > { %p1434_p10 = scmp.lt.u32.totalorder %s1432_s28, %s1428_s17  ;;  %p1436_p12 = scmp.lt.u32.totalorder %s1428_s17, %s2182_s11 }
 0x301   : > { %p1430_p7 = pnand %p1429_p4, %p1540_p5 }
 0x302   : > { %p1435_p11 = por %p1434_p10, %p1433_p9 }
 0x303   : > { %p1431_p8 = pneg %p1430_p7 }
 0x304   : > { %p1437_p13 = por %p1436_p12, %p1435_p11 }
 0x306   : > { %p1438_p0 = pnand %p1437_p13, %p1431_p8 }
 0x308   : > { %1441 = shalt.err (!%p1438_p0)
}
 0x309   : > { %1317 = dma.vmem_to_hbm [thread:$0]  (%p1540_p5), %s2184_s9, 64, %s2182_s11, %s1054_s16  }
 0x30a PF: > { %p1323_p1 = scmp.ge.s32.totalorder %s1476_s15, 2  ;;  %s1079_s4 = sand.u32 1, %s1464_s12  }
 0x30b   : > { %s1080_s5 = scalar_lea.sflag [#allocation3], %s1079_s4 }
 0x30c   : > { %p1320_p2 = pnand %p1323_p1, %p1544_p6 }
 0x30e   : > { %1459 = dma.done.wait (!%p1320_p2), %s1080_s5, 64  }
 0x30f   : > { %1461 = vsyncadd (!%p1320_p2), %s1080_s5, 4294967232  ;;  %p13_p3 = scmp.ge.s32.totalorder %s1527_s18, 4   ;;  %s2276_s12 = smov %s1468_s13 }
 0x310   : > { %s2277_s13 = smov %s1472_s14  ;;  %s2278_s14 = smov %s1538_s21 }
 0x311   : > { %s2279_s15 = smov %s1527_s18  ;;  %15 = sbr.rel (!%p13_p3) target bundleno = 3 (0x3), region = 67 }
 0x318   :  { %1085 = vsyncpa [#allocation3], 1 }
 0x319   :  { %1087 = vsyncpa [#allocation3 + $0x1], 1 }

</bundles_post_ra>
